<compile_context>
chip_gen: v5e
topology: v5e:2x2
jax: 0.10.0
libtpu: 0.0.40
codegen_flags: <defaults>
</compile_context>

<pallas_src>
import jax
import jax.numpy as jnp
from jax.experimental import pallas as pl
from jax.experimental.pallas import tpu as pltpu


def _mixture_kernel(w_ref, lgs_ref, lnull_ref, o_ref):
    # w_ref:     (1, TI, NN)  sigmoid(w_) block -- broadcasts over the batch tile
    # lgs_ref:   (TB, TI, NN) gaussian-process likelihood block
    # lnull_ref: (TB, TI, NN) null-model likelihood block
    # o_ref:     (TB, TI, NN) log-mixture output block
    w = w_ref[...]
    lnull = lnull_ref[...]
    # l_null + w * (l_gs - l_null)  ==  w*l_gs + (1-w)*l_null  (one mul fewer)
    mixture = lnull + w * (lgs_ref[...] - lnull)
    o_ref[...] = jnp.log(mixture)


def _choose_tiles(B, NI, NN, itemsize, target_block_bytes):
    """Pick (TB, TI) so a streamed block is ~target_block_bytes and lane-dense."""
    row_bytes = NN * itemsize
    max_rows = max(1, target_block_bytes // row_bytes)
    if NI <= max_rows:
        # Whole image axis fits -> tile over batch to keep blocks multi-MiB.
        TI = NI
        TB = int(max(1, min(B, max_rows // NI)))
    else:
        # Tile the image axis; keep it a multiple of 8 (sublane granularity).
        TI = int(min(NI, max(8, (max_rows // 8) * 8)))
        TB = 1
    return TB, TI


def mixture_model_forward(w_, l_gs, l_null, *, target_block_bytes=2 << 20):
    """Pallas TPU forward of Mixture_Model.

    w_:     (1, n_images, n_neurons) raw (pre-sigmoid) mixture weights
    l_gs:   (B, n_images, n_neurons) GP likelihoods
    l_null: (B, n_images, n_neurons) null-model likelihoods
    returns (B, n_images, n_neurons)
    """
    B, NI, NN = l_gs.shape
    assert w_.shape == (1, NI, NN)
    assert l_null.shape == (B, NI, NN)

    # Hoist sigmoid: applied once to the (1, NI, NN) parameter (reused for all
    # B batch elements) instead of redoing exp+recip on the EUP per grid step.
    w_sig = jax.nn.sigmoid(w_.astype(jnp.float32)).astype(l_gs.dtype)

    itemsize = jnp.dtype(l_gs.dtype).itemsize
    TB, TI = _choose_tiles(B, NI, NN, itemsize, target_block_bytes)

    n_t = pl.cdiv(NI, TI)  # image-tile axis (outer)
    n_b = pl.cdiv(B, TB)   # batch-tile axis (inner/fastest -> w block reused)

    # NOTE: batch axis is the fastest-varying grid axis, and w's block index
    # does not depend on it, so the broadcast w block is fetched once per
    # image tile rather than once per (tile, batch) step.
    w_spec = pl.BlockSpec((1, TI, NN), lambda t, b: (0, t, 0))
    x_spec = pl.BlockSpec((TB, TI, NN), lambda t, b: (b, t, 0))
    o_spec = pl.BlockSpec((TB, TI, NN), lambda t, b: (b, t, 0))

    # TODO(synk): if n_neurons is not a multiple of 128, pad it (or fold the
    # image axis into lanes) in the wrapper to avoid masked partial stores.
    return pl.pallas_call(
        _mixture_kernel,
        out_shape=jax.ShapeDtypeStruct((B, NI, NN), l_gs.dtype),
        grid_spec=pltpu.PrefetchScalarGridSpec(
            num_scalar_prefetch=0,
            grid=(n_t, n_b),
            in_specs=[w_spec, x_spec, x_spec],
            out_specs=o_spec,
        ),
        compiler_params=pltpu.CompilerParams(
            dimension_semantics=("parallel", "parallel"),
            # Raise scoped VMEM (v5e default is 16 MiB) but stay well under
            # v7x's 64 MiB physical capacity.
            vmem_limit_bytes=48 << 20,
        ),
    )(w_sig, l_gs, l_null)


def mixture_model_reference(w_, l_gs, l_null):
    w = jax.nn.sigmoid(w_)
    return jnp.log(w * l_gs + (1.0 - w) * l_null)


def _make_inputs(key, B, NI, NN):
    k_w, k_gs, k_null = jax.random.split(key, 3)
    # Module init is zeros; use small random values so sigmoid(w_) != 0.5.
    w_ = 0.1 * jax.random.normal(k_w, (1, NI, NN), dtype=jnp.float32)
    # Likelihoods must be positive (log is taken).
    l_gs = jax.random.uniform(k_gs, (B, NI, NN), dtype=jnp.float32,
                              minval=0.05, maxval=2.0)
    l_null = jax.random.uniform(k_null, (B, NI, NN), dtype=jnp.float32,
                                minval=0.05, maxval=2.0)
    return w_, l_gs, l_null


if __name__ == "__main__":
    key = jax.random.PRNGKey(0)

    # Main test: batch=2 "samples", n_images=8, n_neurons=128.
    B, n_images, n_neurons = 2, 8, 128
    w_, l_gs, l_null = _make_inputs(key, B, n_images, n_neurons)

    out = mixture_model_forward(w_, l_gs, l_null)
    out = jax.block_until_ready(out)
    ref = mixture_model_reference(w_, l_gs, l_null)
    assert out.shape == (B, n_images, n_neurons)
    assert jnp.allclose(out, ref, atol=1e-5, rtol=1e-5)

    # Extra check 1: exercise the batch-tiling path (TB=2, grid=(1, 2)).
    k1 = jax.random.PRNGKey(1)
    w2, g2, n2 = _make_inputs(k1, 4, 16, 128)
    out2 = jax.block_until_ready(
        mixture_model_forward(w2, g2, n2,
                              target_block_bytes=2 * 16 * 128 * 4))
    assert jnp.allclose(out2, mixture_model_reference(w2, g2, n2),
                        atol=1e-5, rtol=1e-5)

    # Extra check 2: exercise the image-tiling path (TI=16, grid=(2, B)).
    k2 = jax.random.PRNGKey(2)
    w3, g3, n3 = _make_inputs(k2, 2, 32, 128)
    out3 = jax.block_until_ready(
        mixture_model_forward(w3, g3, n3,
                              target_block_bytes=16 * 128 * 4))
    assert jnp.allclose(out3, mixture_model_reference(w3, g3, n3),
                        atol=1e-5, rtol=1e-5)

    print("KERNEL_OK")
</pallas_src>

<mosaic_0001>
module attributes {stable_mosaic.version = 11 : i64} {
  func.func @_mixture_kernel(%arg0: i32, %arg1: i32, %arg2: memref<1x8x128xf32, #tpu.memory_space<vmem>>, %arg3: memref<2x8x128xf32, #tpu.memory_space<vmem>>, %arg4: memref<2x8x128xf32, #tpu.memory_space<vmem>>, %arg5: memref<2x8x128xf32, #tpu.memory_space<vmem>>) attributes {dimension_semantics = [#tpu.dimension_semantics<parallel>, #tpu.dimension_semantics<parallel>], iteration_bounds = array<i64: 1, 1>, scalar_prefetch = 0 : i64, scratch_operands = 0 : i64, tpu.core_type = #tpu.core_type<tc>, window_params = [{transform_indices = @transform_0, window_bounds = array<i64: 1, 8, 128>}, {transform_indices = @transform_1, window_bounds = array<i64: 2, 8, 128>}, {transform_indices = @transform_2, window_bounds = array<i64: 2, 8, 128>}, {transform_indices = @transform_3, window_bounds = array<i64: 2, 8, 128>}]} {
    %c0 = arith.constant 0 : index
    %c0_0 = arith.constant 0 : index
    %c0_1 = arith.constant 0 : index
    %0 = vector.load %arg2[%c0, %c0_0, %c0_1] : memref<1x8x128xf32, #tpu.memory_space<vmem>>, vector<1x8x128xf32>
    %c0_2 = arith.constant 0 : index
    %c0_3 = arith.constant 0 : index
    %c0_4 = arith.constant 0 : index
    %1 = vector.load %arg4[%c0_2, %c0_3, %c0_4] : memref<2x8x128xf32, #tpu.memory_space<vmem>>, vector<2x8x128xf32>
    %c0_5 = arith.constant 0 : index
    %c0_6 = arith.constant 0 : index
    %c0_7 = arith.constant 0 : index
    %2 = vector.load %arg3[%c0_5, %c0_6, %c0_7] : memref<2x8x128xf32, #tpu.memory_space<vmem>>, vector<2x8x128xf32>
    %3 = arith.subf %2, %1 : vector<2x8x128xf32>
    %4 = vector.broadcast %0 : vector<1x8x128xf32> to vector<2x8x128xf32>
    %5 = arith.mulf %4, %3 : vector<2x8x128xf32>
    %6 = arith.addf %1, %5 : vector<2x8x128xf32>
    %7 = math.log %6 : vector<2x8x128xf32>
    %c0_8 = arith.constant 0 : index
    %c0_9 = arith.constant 0 : index
    %c0_10 = arith.constant 0 : index
    %8 = vector.load %arg5[%c0_8, %c0_9, %c0_10] : memref<2x8x128xf32, #tpu.memory_space<vmem>>, vector<2x8x128xf32>
    tpu.vector_store %arg5[%c0_8, %c0_9, %c0_10], %7 {strides = array<i32>} : memref<2x8x128xf32, #tpu.memory_space<vmem>>, vector<2x8x128xf32>,
    return
  }
  func.func @transform_0(%arg0: i32, %arg1: i32) -> (i32, i32, i32) {
    %c0_i32 = arith.constant 0 : i32
    %c0_i32_0 = arith.constant 0 : i32
    %c0_i32_1 = arith.constant 0 : i32
    return %c0_i32, %arg0, %c0_i32_0 : i32, i32, i32
  }
  func.func @transform_1(%arg0: i32, %arg1: i32) -> (i32, i32, i32) {
    %c0_i32 = arith.constant 0 : i32
    %c0_i32_0 = arith.constant 0 : i32
    return %arg1, %arg0, %c0_i32 : i32, i32, i32
  }
  func.func @transform_2(%arg0: i32, %arg1: i32) -> (i32, i32, i32) {
    %c0_i32 = arith.constant 0 : i32
    %c0_i32_0 = arith.constant 0 : i32
    return %arg1, %arg0, %c0_i32 : i32, i32, i32
  }
  func.func @transform_3(%arg0: i32, %arg1: i32) -> (i32, i32, i32) {
    %c0_i32 = arith.constant 0 : i32
    %c0_i32_0 = arith.constant 0 : i32
    return %arg1, %arg0, %c0_i32 : i32, i32, i32
  }
}

</mosaic_0001>

<bundles_post_ra>
// kernel: tpu_custom_call.1
= control target key start
LH: loop header
LB: loop body
LE: loop exit
PB: predicated region body
PF: predicated region fallthrough
CT: control target
= control target key end

     0   :  { %8 = vsyncpa [#allocation3], 0  ;;  %s256_s0 = inlined_call_operand.hbm [shape: f32[1,8,128], index: 0, kind: input, shape index: {}]   ;;  %s257_s1 = inlined_call_operand.hbm [shape: f32[2,8,128], index: 1, kind: input, shape index: {}]   ;;  %s258_s2 = inlined_call_operand.hbm [shape: f32[2,8,128], index: 2, kind: input, shape index: {}]   ;;  %s259_s3 = inlined_call_operand.hbm [shape: f32[2,8,128], index: 3, kind: output, shape index: {}]  }
   0x1   :  { %9 = vsyncpa [#allocation6], 0  ;;  %s26_s14 = sshll.u32 %s257_s1, 4  ;;  %s27_s14 = int_to_ptr.hbm [resolvable:$true] %s26_s14 }
   0x2   :  { %10 = vsyncpa [#allocation4], 0  ;;  %s209_s15 = smov [#allocation5]   ;;  %s16_s19 = sshll.u32 %s256_s0, 4  ;;  %s17_s19 = int_to_ptr.hbm [resolvable:$true] %s16_s19 }
   0x3   :  { %s28_s16 = sshll.u32 %s209_s15, 4  ;;  %s210_s20 = smov 128   ;;  %s29_s16 = int_to_ptr.vmem [resolvable:$true] %s28_s16 }
   0x4   :  { %s211_s21 = smov 8   ;;  %s212_s22 = smov [#allocation2]  }
   0x5   :  { %34 = dma.hbm_to_vmem [thread:$0]  %s27_s14, 256, %s29_s16, [#allocation6], %s210_s20, %s210_s20, %s211_s21  }
   0x6   :  { %s18_s23 = sshll.u32 %s212_s22, 4  ;;  %s39_s25 = sshll.u32 %s258_s2, 4  ;;  %s19_s23 = int_to_ptr.vmem [resolvable:$true] %s18_s23  ;;  %s40_s25 = int_to_ptr.hbm [resolvable:$true] %s39_s25 }
   0x7   :  { %21 = dma.hbm_to_vmem [thread:$0]  %s17_s19, 128, %s19_s23, [#allocation3]  }
   0x8   :  { %s213_s26 = smov [#allocation7]  }
   0x9   :  { %s41_s27 = sshll.u32 %s213_s26, 4  ;;  %s42_s27 = int_to_ptr.vmem [resolvable:$true] %s41_s27 }
   0xa   :  { %47 = dma.hbm_to_vmem [thread:$0]  %s40_s25, 256, %s42_s27, [#allocation6], %s210_s20, %s210_s20, %s211_s21  }
   0xb   :  { %203 = dma.done.wait [#allocation3], 128  }
   0xc   :  { %204 = vsyncadd [#allocation3], 4294967168 }
   0xd   :  { %205 = dma.done.wait [#allocation6], 512  }
   0xe   :  { %206 = vsyncadd [#allocation6], 4294966784  ;;  %v60_v0 = vld [vmem:[#allocation2] sm:$0xff]  ;;  %v61_v1 = vld [vmem:[#allocation7] sm:$0xff]  ;;  %s214_s0 = smov [#allocation8]   ;;  %s83_s30 = sshll.u32 %s259_s3, 4  ;;  %s84_s30 = int_to_ptr.hbm [resolvable:$true] %s83_s30 }
   0xf   :  { %v63_v2 = vld [vmem:[#allocation5] sm:$0xff]  ;;  %v62_v4 = vld [vmem:[#allocation7 + $0x8] sm:$0xff]  ;;  %v64_v5 = vld [vmem:[#allocation5 + $0x8] sm:$0xff]  ;;  %s81_s2 = sshll.u32 %s214_s0, 4  ;;  %s82_s2 = int_to_ptr.vmem [resolvable:$true] %s81_s2 }
  0x10   :  { %v65_v3 = vsub.f32 %v63_v2, %v61_v1  ;;  %v66_v6 = vsub.f32 %v64_v5, %v62_v4 }
  0x12   :  { %v67_v7 = vmul.f32 %v65_v3, %v60_v0  ;;  %v68_v8 = vmul.f32 %v66_v6, %v60_v0 }
  0x14   :  { %v69_v9 = vadd.f32 %v67_v7, %v61_v1  ;;  %v70_v10 = vadd.f32 %v68_v8, %v62_v4 }
  0x16   :  { %103 = vlog2.f32 %v69_v9 }
  0x17   :  { %105 = vlog2.f32 %v70_v10 }
  0x1c   :  { %v104_v11 = vpop.eup %103 }
  0x1d   :  { %v106_v12 = vpop.eup %105  ;;  %v72_v13 = vmul.f32 0.6931472, %v104_v11 }
  0x1e   :  { %v74_v14 = vmul.f32 0.6931472, %v106_v12 }
  0x1f   :  { %75 = vst [vmem:[#allocation8] sm:$0xff] %v72_v13 }
  0x20   :  { %76 = vst [vmem:[#allocation8 + $0x8] sm:$0xff] %v74_v14 }
  0x21   :  { %89 = dma.vmem_to_hbm [thread:$0]  %s82_s2, 256, %s84_s30, [#allocation4], %s210_s20, %s210_s20, %s211_s21  }
  0x22   :  { %207 = dma.done.wait [#allocation4], 256  }
  0x23   :  { %208 = vsyncadd [#allocation4], 4294967040 }
  0x24   :  { %94 = vsyncpa [#allocation3], 1 }
  0x25   :  { %95 = vsyncpa [#allocation6], 1 }
  0x26   :  { %96 = vsyncpa [#allocation4], 1 }

</bundles_post_ra>
